<compile_context>
chip_gen: v7x
topology: tpu7x:2x2x1
jax: 0.10.0
libtpu: 0.0.40
codegen_flags: <defaults>
</compile_context>

<pallas_src>
import functools

import jax
import jax.numpy as jnp
from jax.experimental import pallas as pl
from jax.experimental.pallas import tpu as pltpu


def _yolo_kernel(x_ref, w1_ref, shift_ref, w2_ref, b2_ref, mask_ref, o_ref,
                 stack_ref, *, wp, cin):
    """One (batch, row-band) tile per grid step.

    x_ref    : (1, 1, Cin, band_len)     bf16  zero-padded row band, rows flattened
    w1_ref   : (Cmid_pad, 9*Cin)         bf16  3x3 weights (BN scale folded), tap-major K
    shift_ref: (Cmid_pad, 1)             f32   folded BN shift
    w2_ref   : (Cout_pad, Cmid_pad)      f32   1x1 conv weights (transposed, zero-padded)
    b2_ref   : (Cout_pad, 1)             f32   1x1 conv bias
    mask_ref : (Cout_pad, 1)             f32   1.0 where channel keeps raw value (t_w, t_h)
    o_ref    : (1, 1, Cout_pad, n_pad)   f32   lane-dense output (flattened HW on lanes)
    stack_ref: (9*Cin, n_pad)            bf16  VMEM scratch holding the 9 shifted taps
    """
    n = o_ref.shape[3]                    # lane-padded HW length (multiple of 128)

    # Build the (9*Cin, n) tap stack once, then a single fused MXU dot with
    # contraction K = 9*Cin (accumulation happens inside the MXU).
    for kh in range(3):
        for kw in range(3):
            tap = kh * 3 + kw
            s = kh * wp + kw              # static lane offset of this tap
            stack_ref[pl.ds(tap * cin, cin), :] = x_ref[0, 0, :, pl.ds(s, n)]

    acc = jnp.dot(w1_ref[...], stack_ref[...],
                  preferred_element_type=jnp.float32)        # (Cmid_pad, n) f32

    # BatchNorm (eval; scale already folded into w1) + LeakyReLU(0.01).
    h = acc + shift_ref[...]
    h = jnp.where(h > 0, h, 0.01 * h)

    # 1x1 conv + bias on the (otherwise idle) MXU.
    y = jnp.dot(w2_ref[...], h, preferred_element_type=jnp.float32) + b2_ref[...]

    # Selective sigmoid: every channel except t_w, t_h (k == 2, 3 per anchor).
    # sigmoid(y) == 0.5*tanh(0.5*y) + 0.5  -> one EUP push, no divide.
    sig = 0.5 * jnp.tanh(0.5 * y) + 0.5
    o_ref[0, 0] = jnp.where(mask_ref[...] > 0.5, y, sig)


def _round_up(v, m):
    return -(-v // m) * m


def _choose_tile_h(B, H, W, Cin, Cmid_pad, Cout_pad,
                   budget_bytes=8 * 1024 * 1024, min_grid=2):
    """Largest divisor of H whose per-step VMEM footprint fits the budget,
    preferring >= min_grid total grid steps (keeps both v7x TensorCores busy)."""
    wp = W + 2
    divisors = sorted((d for d in range(1, H + 1) if H % d == 0), reverse=True)

    def footprint(th):
        n_pad = _round_up(th * wp, 128)
        rows = -(-(n_pad + 2 * wp + 2) // wp)
        band = Cin * rows * wp * 2                       # bf16 input band
        out = Cout_pad * n_pad * 4                       # f32 output tile
        stack = 9 * Cin * n_pad * 2                      # bf16 tap-stack scratch
        temps = (Cmid_pad + 3 * Cout_pad) * n_pad * 4    # acc/h + y/sig/select
        weights = Cmid_pad * 9 * Cin * 2 + Cout_pad * Cmid_pad * 4
        return 2 * (band + out) + stack + temps + 2 * weights  # double-buffered I/O

    fitting = [d for d in divisors if footprint(d) <= budget_bytes]
    if not fitting:
        return divisors[-1]                              # best effort (tile_h == 1)
    for d in fitting:                                    # largest tile giving >=2 steps
        if B * (H // d) >= min_grid:
            return d
    return fitting[0]


@functools.partial(jax.jit,
                   static_argnames=("num_anchors", "num_classes", "tile_h"))
def yolo_detector_forward(x_nchw, w1_hwio, bn_gamma, bn_beta, bn_mean, bn_var,
                          w2_io, b2, *, num_anchors, num_classes, tile_h=None):
    """x_nchw: (B, Cin, H, W) float32 -> (B, A, H, W, 5 + C) float32."""
    eps = 1e-5
    B, Cin, H, W = x_nchw.shape
    Cmid = w1_hwio.shape[-1]
    K = 5 + num_classes
    Cout = num_anchors * K
    Wp = W + 2

    Cmid_pad = max(8, _round_up(Cmid, 8))
    Cout_pad = _round_up(Cout, 8)

    if tile_h is None:
        tile_h = _choose_tile_h(B, H, W, Cin, Cmid_pad, Cout_pad)
    assert H % tile_h == 0, "tile_h must divide H"
    nH = H // tile_h

    n = tile_h * Wp                                   # valid flattened HW length
    n_pad = _round_up(n, 128)                         # lane-dense (unmasked vst)
    rows_per_band = -(-(n_pad + 2 * Wp + 2) // Wp)    # rows so every tap slice is in range
    band_len = rows_per_band * Wp

    # ---- glue: fold BN scale into w1, pad channels, channel-major weights --
    scale = bn_gamma / jnp.sqrt(bn_var + eps)                            # (Cmid,)
    shift = bn_beta - bn_mean * scale
    w1s = w1_hwio.astype(jnp.float32) * scale                            # (3,3,Cin,Cmid)
    w1s = jnp.transpose(w1s, (3, 0, 1, 2)).reshape(Cmid, 9 * Cin)        # tap-major K
    w1s = jnp.pad(w1s, ((0, Cmid_pad - Cmid), (0, 0))).astype(jnp.bfloat16)
    shift_p = jnp.pad(shift, (0, Cmid_pad - Cmid)).reshape(Cmid_pad, 1).astype(jnp.float32)
    w2t = jnp.transpose(w2_io, (1, 0)).astype(jnp.float32)               # (Cout, Cmid)
    w2t = jnp.pad(w2t, ((0, Cout_pad - Cout), (0, Cmid_pad - Cmid)))
    b2c = jnp.pad(b2, (0, Cout_pad - Cout)).reshape(Cout_pad, 1).astype(jnp.float32)
    k_idx = jnp.arange(Cout_pad) % K
    keep_raw = ((k_idx == 2) | (k_idx == 3)).astype(jnp.float32).reshape(Cout_pad, 1)

    # ---- glue: bf16 cast, zero-pad, split into overlapping row bands -------
    xb = x_nchw.astype(jnp.bfloat16)
    pad_bottom = (nH - 1) * tile_h + rows_per_band - (H + 1)
    x_pad = jnp.pad(xb, ((0, 0), (0, 0), (1, pad_bottom), (1, 1)))       # (B,Cin,Hp,Wp)
    rows = (jnp.arange(nH)[:, None] * tile_h
            + jnp.arange(rows_per_band)[None, :]).reshape(-1)
    x_band = jnp.take(x_pad, rows, axis=2)                               # (B,Cin,nH*rpb,Wp)
    x_band = x_band.reshape(B, Cin, nH, rows_per_band, Wp)
    x_band = jnp.transpose(x_band, (0, 2, 1, 3, 4)).reshape(B, nH, Cin, band_len)

    # ---- Pallas call --------------------------------------------------------
    out = pl.pallas_call(
        functools.partial(_yolo_kernel, wp=Wp, cin=Cin),
        out_shape=jax.ShapeDtypeStruct((B, nH, Cout_pad, n_pad), jnp.float32),
        grid_spec=pltpu.PrefetchScalarGridSpec(
            num_scalar_prefetch=0,
            grid=(B, nH),
            in_specs=[
                pl.BlockSpec((1, 1, Cin, band_len), lambda b, t: (b, t, 0, 0)),
                pl.BlockSpec((Cmid_pad, 9 * Cin), lambda b, t: (0, 0)),
                pl.BlockSpec((Cmid_pad, 1), lambda b, t: (0, 0)),
                pl.BlockSpec((Cout_pad, Cmid_pad), lambda b, t: (0, 0)),
                pl.BlockSpec((Cout_pad, 1), lambda b, t: (0, 0)),
                pl.BlockSpec((Cout_pad, 1), lambda b, t: (0, 0)),
            ],
            out_specs=pl.BlockSpec((1, 1, Cout_pad, n_pad),
                                   lambda b, t: (b, t, 0, 0)),
            scratch_shapes=[pltpu.VMEM((9 * Cin, n_pad), jnp.bfloat16)],
        ),
        compiler_params=pltpu.CompilerParams(
            dimension_semantics=("parallel", "parallel"),
            vmem_limit_bytes=48 * 1024 * 1024),
    )(x_band, w1s, shift_p, w2t, b2c, keep_raw)

    # ---- glue: drop pad rows/cols, permute to PyTorch layout (B,A,H,W,5+C) --
    out = out[:, :, :Cout, :n].reshape(B, nH, Cout, tile_h, Wp)[..., :W]
    out = jnp.transpose(out, (0, 2, 1, 3, 4)).reshape(B, Cout, H, W)
    pred = out.reshape(B, num_anchors, K, H, W)
    return jnp.transpose(pred, (0, 1, 3, 4, 2))


def _reference(x_nchw, w1_hwio, bn_gamma, bn_beta, bn_mean, bn_var, w2_io, b2,
               num_anchors, num_classes):
    """Pure-JAX f32 reference (same math) for a sanity check."""
    eps = 1e-5
    K = 5 + num_classes
    x = jnp.transpose(x_nchw, (0, 2, 3, 1))
    y = jax.lax.conv_general_dilated(
        x, w1_hwio, window_strides=(1, 1), padding="SAME",
        dimension_numbers=("NHWC", "HWIO", "NHWC"))
    y = y * (bn_gamma / jnp.sqrt(bn_var + eps)) + (
        bn_beta - bn_mean * bn_gamma / jnp.sqrt(bn_var + eps))
    y = jnp.where(y > 0, y, 0.01 * y)
    y = jnp.einsum("bhwc,cd->bhwd", y, w2_io) + b2
    B, H, W, Cout = y.shape
    pred = y.reshape(B, H, W, num_anchors, K).transpose(0, 3, 1, 2, 4)
    sig = jax.nn.sigmoid(pred)
    k = jnp.arange(K)
    keep_raw = (k == 2) | (k == 3)
    return jnp.where(keep_raw, pred, sig)


if __name__ == "__main__":
    # Small deterministic config consistent with YoloDetector(in_ch=8).
    B, Cin, H, W = 2, 8, 16, 16
    num_anchors, num_classes = 3, 3
    Cmid = round(Cin / 2)                       # 4
    Cout = num_anchors * (5 + num_classes)      # 24

    key = jax.random.PRNGKey(0)
    ks = jax.random.split(key, 8)
    x = jax.random.normal(ks[0], (B, Cin, H, W), jnp.float32)
    w1 = jax.random.normal(ks[1], (3, 3, Cin, Cmid), jnp.float32) * 0.1   # HWIO
    bn_gamma = 1.0 + 0.1 * jax.random.normal(ks[2], (Cmid,), jnp.float32)
    bn_beta = 0.1 * jax.random.normal(ks[3], (Cmid,), jnp.float32)
    bn_mean = 0.1 * jax.random.normal(ks[4], (Cmid,), jnp.float32)
    bn_var = jnp.abs(1.0 + 0.1 * jax.random.normal(ks[5], (Cmid,), jnp.float32))
    w2 = jax.random.normal(ks[6], (Cmid, Cout), jnp.float32) * 0.1
    b2 = 0.1 * jax.random.normal(ks[7], (Cout,), jnp.float32)

    # tile_h=8 -> 2 row bands per image: exercises the (B, nH) tiled grid path
    # and keeps >= 2 grid steps (both v7x TensorCores busy).
    out = yolo_detector_forward(
        x, w1, bn_gamma, bn_beta, bn_mean, bn_var, w2, b2,
        num_anchors=num_anchors, num_classes=num_classes, tile_h=8)
    out = jax.block_until_ready(out)

    ref = _reference(x, w1, bn_gamma, bn_beta, bn_mean, bn_var, w2, b2,
                     num_anchors, num_classes)
    assert out.shape == (B, num_anchors, H, W, 5 + num_classes), out.shape
    # bf16 matmul operands with f32 accumulation -> loosened tolerance.
    assert jnp.allclose(out, ref, atol=3e-2, rtol=3e-2), float(
        jnp.max(jnp.abs(out - ref)))
    print("KERNEL_OK")
</pallas_src>

<mosaic_0001>
module attributes {stable_mosaic.version = 11 : i64} {
  func.func @_yolo_kernel(%arg0: i32, %arg1: i32, %arg2: memref<1x1x8x306xbf16, #tpu.memory_space<vmem>>, %arg3: memref<8x72xbf16, #tpu.memory_space<vmem>>, %arg4: memref<8x1xf32, #tpu.memory_space<vmem>>, %arg5: memref<24x8xf32, #tpu.memory_space<vmem>>, %arg6: memref<24x1xf32, #tpu.memory_space<vmem>>, %arg7: memref<24x1xf32, #tpu.memory_space<vmem>>, %arg8: memref<1x1x24x256xf32, #tpu.memory_space<vmem>>, %arg9: memref<72x256xbf16, #tpu.memory_space<vmem>>) attributes {dimension_semantics = [#tpu.dimension_semantics<parallel>, #tpu.dimension_semantics<parallel>], iteration_bounds = array<i64: 2, 2>, scalar_prefetch = 0 : i64, scratch_operands = 1 : i64, tpu.core_type = #tpu.core_type<tc>, window_params = [{transform_indices = @transform_0, window_bounds = array<i64: 1, 1, 8, 306>}, {pipeline_mode = #tpu.pipeline_mode<synchronous>, transform_indices = @transform_1, window_bounds = array<i64: 8, 72>}, {pipeline_mode = #tpu.pipeline_mode<synchronous>, transform_indices = @transform_2, window_bounds = array<i64: 8, 1>}, {pipeline_mode = #tpu.pipeline_mode<synchronous>, transform_indices = @transform_3, window_bounds = array<i64: 24, 8>}, {pipeline_mode = #tpu.pipeline_mode<synchronous>, transform_indices = @transform_4, window_bounds = array<i64: 24, 1>}, {pipeline_mode = #tpu.pipeline_mode<synchronous>, transform_indices = @transform_5, window_bounds = array<i64: 24, 1>}, {transform_indices = @transform_6, window_bounds = array<i64: 1, 1, 24, 256>}]} {
    %c0 = arith.constant 0 : index
    %c0_0 = arith.constant 0 : index
    %c0_1 = arith.constant 0 : index
    %c0_2 = arith.constant 0 : index
    %0 = vector.load %arg2[%c0, %c0_0, %c0_1, %c0_2] : memref<1x1x8x306xbf16, #tpu.memory_space<vmem>>, vector<1x1x8x256xbf16>
    %1 = vector.shape_cast %0 : vector<1x1x8x256xbf16> to vector<8x256xbf16>
    %c0_3 = arith.constant 0 : index
    %c0_4 = arith.constant 0 : index
    %2 = vector.load %arg9[%c0_3, %c0_4] : memref<72x256xbf16, #tpu.memory_space<vmem>>, vector<8x256xbf16>
    tpu.vector_store %arg9[%c0_3, %c0_4], %1 {strides = array<i32>} : memref<72x256xbf16, #tpu.memory_space<vmem>>, vector<8x256xbf16>,
    %c0_5 = arith.constant 0 : index
    %c0_6 = arith.constant 0 : index
    %c0_7 = arith.constant 0 : index
    %c1 = arith.constant 1 : index
    %3 = vector.load %arg2[%c0_5, %c0_6, %c0_7, %c1] : memref<1x1x8x306xbf16, #tpu.memory_space<vmem>>, vector<1x1x8x256xbf16>
    %4 = vector.shape_cast %3 : vector<1x1x8x256xbf16> to vector<8x256xbf16>
    %c8 = arith.constant 8 : index
    %c0_8 = arith.constant 0 : index
    %5 = vector.load %arg9[%c8, %c0_8] : memref<72x256xbf16, #tpu.memory_space<vmem>>, vector<8x256xbf16>
    tpu.vector_store %arg9[%c8, %c0_8], %4 {strides = array<i32>} : memref<72x256xbf16, #tpu.memory_space<vmem>>, vector<8x256xbf16>,
    %c0_9 = arith.constant 0 : index
    %c0_10 = arith.constant 0 : index
    %c0_11 = arith.constant 0 : index
    %c2 = arith.constant 2 : index
    %6 = vector.load %arg2[%c0_9, %c0_10, %c0_11, %c2] : memref<1x1x8x306xbf16, #tpu.memory_space<vmem>>, vector<1x1x8x256xbf16>
    %7 = vector.shape_cast %6 : vector<1x1x8x256xbf16> to vector<8x256xbf16>
    %c16 = arith.constant 16 : index
    %c0_12 = arith.constant 0 : index
    %8 = vector.load %arg9[%c16, %c0_12] : memref<72x256xbf16, #tpu.memory_space<vmem>>, vector<8x256xbf16>
    tpu.vector_store %arg9[%c16, %c0_12], %7 {strides = array<i32>} : memref<72x256xbf16, #tpu.memory_space<vmem>>, vector<8x256xbf16>,
    %c0_13 = arith.constant 0 : index
    %c0_14 = arith.constant 0 : index
    %c0_15 = arith.constant 0 : index
    %c18 = arith.constant 18 : index
    %9 = vector.load %arg2[%c0_13, %c0_14, %c0_15, %c18] : memref<1x1x8x306xbf16, #tpu.memory_space<vmem>>, vector<1x1x8x256xbf16>
    %10 = vector.shape_cast %9 : vector<1x1x8x256xbf16> to vector<8x256xbf16>
    %c24 = arith.constant 24 : index
    %c0_16 = arith.constant 0 : index
    %11 = vector.load %arg9[%c24, %c0_16] : memref<72x256xbf16, #tpu.memory_space<vmem>>, vector<8x256xbf16>
    tpu.vector_store %arg9[%c24, %c0_16], %10 {strides = array<i32>} : memref<72x256xbf16, #tpu.memory_space<vmem>>, vector<8x256xbf16>,
    %c0_17 = arith.constant 0 : index
    %c0_18 = arith.constant 0 : index
    %c0_19 = arith.constant 0 : index
    %c19 = arith.constant 19 : index
    %12 = vector.load %arg2[%c0_17, %c0_18, %c0_19, %c19] : memref<1x1x8x306xbf16, #tpu.memory_space<vmem>>, vector<1x1x8x256xbf16>
    %13 = vector.shape_cast %12 : vector<1x1x8x256xbf16> to vector<8x256xbf16>
    %c32 = arith.constant 32 : index
    %c0_20 = arith.constant 0 : index
    %14 = vector.load %arg9[%c32, %c0_20] : memref<72x256xbf16, #tpu.memory_space<vmem>>, vector<8x256xbf16>
    tpu.vector_store %arg9[%c32, %c0_20], %13 {strides = array<i32>} : memref<72x256xbf16, #tpu.memory_space<vmem>>, vector<8x256xbf16>,
    %c0_21 = arith.constant 0 : index
    %c0_22 = arith.constant 0 : index
    %c0_23 = arith.constant 0 : index
    %c20 = arith.constant 20 : index
    %15 = vector.load %arg2[%c0_21, %c0_22, %c0_23, %c20] : memref<1x1x8x306xbf16, #tpu.memory_space<vmem>>, vector<1x1x8x256xbf16>
    %16 = vector.shape_cast %15 : vector<1x1x8x256xbf16> to vector<8x256xbf16>
    %c40 = arith.constant 40 : index
    %c0_24 = arith.constant 0 : index
    %17 = vector.load %arg9[%c40, %c0_24] : memref<72x256xbf16, #tpu.memory_space<vmem>>, vector<8x256xbf16>
    tpu.vector_store %arg9[%c40, %c0_24], %16 {strides = array<i32>} : memref<72x256xbf16, #tpu.memory_space<vmem>>, vector<8x256xbf16>,
    %c0_25 = arith.constant 0 : index
    %c0_26 = arith.constant 0 : index
    %c0_27 = arith.constant 0 : index
    %c36 = arith.constant 36 : index
    %18 = vector.load %arg2[%c0_25, %c0_26, %c0_27, %c36] : memref<1x1x8x306xbf16, #tpu.memory_space<vmem>>, vector<1x1x8x256xbf16>
    %19 = vector.shape_cast %18 : vector<1x1x8x256xbf16> to vector<8x256xbf16>
    %c48 = arith.constant 48 : index
    %c0_28 = arith.constant 0 : index
    %20 = vector.load %arg9[%c48, %c0_28] : memref<72x256xbf16, #tpu.memory_space<vmem>>, vector<8x256xbf16>
    tpu.vector_store %arg9[%c48, %c0_28], %19 {strides = array<i32>} : memref<72x256xbf16, #tpu.memory_space<vmem>>, vector<8x256xbf16>,
    %c0_29 = arith.constant 0 : index
    %c0_30 = arith.constant 0 : index
    %c0_31 = arith.constant 0 : index
    %c37 = arith.constant 37 : index
    %21 = vector.load %arg2[%c0_29, %c0_30, %c0_31, %c37] : memref<1x1x8x306xbf16, #tpu.memory_space<vmem>>, vector<1x1x8x256xbf16>
    %22 = vector.shape_cast %21 : vector<1x1x8x256xbf16> to vector<8x256xbf16>
    %c56 = arith.constant 56 : index
    %c0_32 = arith.constant 0 : index
    %23 = vector.load %arg9[%c56, %c0_32] : memref<72x256xbf16, #tpu.memory_space<vmem>>, vector<8x256xbf16>
    tpu.vector_store %arg9[%c56, %c0_32], %22 {strides = array<i32>} : memref<72x256xbf16, #tpu.memory_space<vmem>>, vector<8x256xbf16>,
    %c0_33 = arith.constant 0 : index
    %c0_34 = arith.constant 0 : index
    %c0_35 = arith.constant 0 : index
    %c38 = arith.constant 38 : index
    %24 = vector.load %arg2[%c0_33, %c0_34, %c0_35, %c38] : memref<1x1x8x306xbf16, #tpu.memory_space<vmem>>, vector<1x1x8x256xbf16>
    %25 = vector.shape_cast %24 : vector<1x1x8x256xbf16> to vector<8x256xbf16>
    %c64 = arith.constant 64 : index
    %c0_36 = arith.constant 0 : index
    %26 = vector.load %arg9[%c64, %c0_36] : memref<72x256xbf16, #tpu.memory_space<vmem>>, vector<8x256xbf16>
    tpu.vector_store %arg9[%c64, %c0_36], %25 {strides = array<i32>} : memref<72x256xbf16, #tpu.memory_space<vmem>>, vector<8x256xbf16>,
    %c0_37 = arith.constant 0 : index
    %c0_38 = arith.constant 0 : index
    %27 = vector.load %arg3[%c0_37, %c0_38] : memref<8x72xbf16, #tpu.memory_space<vmem>>, vector<8x72xbf16>
    %c0_39 = arith.constant 0 : index
    %c0_40 = arith.constant 0 : index
    %28 = vector.load %arg9[%c0_39, %c0_40] : memref<72x256xbf16, #tpu.memory_space<vmem>>, vector<72x256xbf16>
    %cst = arith.constant dense<0.000000e+00> : vector<8x256xf32>
    %29 = tpu.matmul %27, %28, %cst {dimension_numbers = #tpu.dot_dimension_numbers<[1], [0], [0], [1], [0, 0, 1, 1], [], []>} : vector<8x72xbf16>, vector<72x256xbf16>, vector<8x256xf32> -> vector<8x256xf32>
    %c0_41 = arith.constant 0 : index
    %c0_42 = arith.constant 0 : index
    %30 = vector.load %arg4[%c0_41, %c0_42] : memref<8x1xf32, #tpu.memory_space<vmem>>, vector<8x1xf32>
    %31 = vector.broadcast %30 : vector<8x1xf32> to vector<8x256xf32>
    %32 = arith.addf %29, %31 : vector<8x256xf32>
    %cst_43 = arith.constant 0.000000e+00 : f32
    %33 = vector.broadcast %cst_43 : f32 to vector<8x256xf32>
    %34 = arith.cmpf ogt, %32, %33 : vector<8x256xf32>
    %cst_44 = arith.constant 0.00999999977 : f32
    %35 = vector.broadcast %cst_44 : f32 to vector<8x256xf32>
    %36 = arith.mulf %35, %32 : vector<8x256xf32>
    %37 = arith.select %34, %32, %36 : vector<8x256xi1>, vector<8x256xf32>
    %c0_45 = arith.constant 0 : index
    %c0_46 = arith.constant 0 : index
    %38 = vector.load %arg5[%c0_45, %c0_46] : memref<24x8xf32, #tpu.memory_space<vmem>>, vector<24x8xf32>
    %cst_47 = arith.constant dense<0.000000e+00> : vector<24x256xf32>
    %39 = tpu.matmul %38, %37, %cst_47 {dimension_numbers = #tpu.dot_dimension_numbers<[1], [0], [0], [1], [0, 0, 1, 1], [], []>} : vector<24x8xf32>, vector<8x256xf32>, vector<24x256xf32> -> vector<24x256xf32>
    %c0_48 = arith.constant 0 : index
    %c0_49 = arith.constant 0 : index
    %40 = vector.load %arg6[%c0_48, %c0_49] : memref<24x1xf32, #tpu.memory_space<vmem>>, vector<24x1xf32>
    %41 = vector.broadcast %40 : vector<24x1xf32> to vector<24x256xf32>
    %42 = arith.addf %39, %41 : vector<24x256xf32>
    %cst_50 = arith.constant 5.000000e-01 : f32
    %43 = vector.broadcast %cst_50 : f32 to vector<24x256xf32>
    %44 = arith.mulf %43, %42 : vector<24x256xf32>
    %45 = math.tanh %44 : vector<24x256xf32>
    %cst_51 = arith.constant 5.000000e-01 : f32
    %46 = vector.broadcast %cst_51 : f32 to vector<24x256xf32>
    %47 = arith.mulf %46, %45 : vector<24x256xf32>
    %cst_52 = arith.constant 5.000000e-01 : f32
    %48 = vector.broadcast %cst_52 : f32 to vector<24x256xf32>
    %49 = arith.addf %47, %48 : vector<24x256xf32>
    %c0_53 = arith.constant 0 : index
    %c0_54 = arith.constant 0 : index
    %50 = vector.load %arg7[%c0_53, %c0_54] : memref<24x1xf32, #tpu.memory_space<vmem>>, vector<24x1xf32>
    %cst_55 = arith.constant 5.000000e-01 : f32
    %51 = vector.broadcast %cst_55 : f32 to vector<24x1xf32>
    %52 = arith.cmpf ogt, %50, %51 : vector<24x1xf32>
    %53 = vector.shape_cast %52 : vector<24x1xi1> to vector<24x1xi1>
    %54 = vector.broadcast %53 : vector<24x1xi1> to vector<24x256xi1>
    %55 = arith.select %54, %42, %49 : vector<24x256xi1>, vector<24x256xf32>
    %c0_56 = arith.constant 0 : index
    %c0_57 = arith.constant 0 : index
    %c0_58 = arith.constant 0 : index
    %c0_59 = arith.constant 0 : index
    %56 = vector.load %arg8[%c0_56, %c0_57, %c0_58, %c0_59] : memref<1x1x24x256xf32, #tpu.memory_space<vmem>>, vector<1x1x24x256xf32>
    %57 = vector.shape_cast %56 : vector<1x1x24x256xf32> to vector<24x256xf32>
    %58 = vector.shape_cast %55 : vector<24x256xf32> to vector<1x1x24x256xf32>
    tpu.vector_store %arg8[%c0_56, %c0_57, %c0_58, %c0_59], %58 {strides = array<i32>} : memref<1x1x24x256xf32, #tpu.memory_space<vmem>>, vector<1x1x24x256xf32>,
    return
  }
  func.func @transform_0(%arg0: i32, %arg1: i32) -> (i32, i32, i32, i32) {
    %c0_i32 = arith.constant 0 : i32
    %c0_i32_0 = arith.constant 0 : i32
    %c0_i32_1 = arith.constant 0 : i32
    return %arg0, %arg1, %c0_i32, %c0_i32_0 : i32, i32, i32, i32
  }
  func.func @transform_1(%arg0: i32, %arg1: i32) -> (i32, i32) {
    %c0_i32 = arith.constant 0 : i32
    %c0_i32_0 = arith.constant 0 : i32
    %c0_i32_1 = arith.constant 0 : i32
    return %c0_i32, %c0_i32_0 : i32, i32
  }
  func.func @transform_2(%arg0: i32, %arg1: i32) -> (i32, i32) {
    %c0_i32 = arith.constant 0 : i32
    %c0_i32_0 = arith.constant 0 : i32
    %c0_i32_1 = arith.constant 0 : i32
    return %c0_i32, %c0_i32_0 : i32, i32
  }
  func.func @transform_3(%arg0: i32, %arg1: i32) -> (i32, i32) {
    %c0_i32 = arith.constant 0 : i32
    %c0_i32_0 = arith.constant 0 : i32
    %c0_i32_1 = arith.constant 0 : i32
    return %c0_i32, %c0_i32_0 : i32, i32
  }
  func.func @transform_4(%arg0: i32, %arg1: i32) -> (i32, i32) {
    %c0_i32 = arith.constant 0 : i32
    %c0_i32_0 = arith.constant 0 : i32
    %c0_i32_1 = arith.constant 0 : i32
    return %c0_i32, %c0_i32_0 : i32, i32
  }
  func.func @transform_5(%arg0: i32, %arg1: i32) -> (i32, i32) {
    %c0_i32 = arith.constant 0 : i32
    %c0_i32_0 = arith.constant 0 : i32
    %c0_i32_1 = arith.constant 0 : i32
    return %c0_i32, %c0_i32_0 : i32, i32
  }
  func.func @transform_6(%arg0: i32, %arg1: i32) -> (i32, i32, i32, i32) {
    %c0_i32 = arith.constant 0 : i32
    %c0_i32_0 = arith.constant 0 : i32
    %c0_i32_1 = arith.constant 0 : i32
    return %arg0, %arg1, %c0_i32, %c0_i32_0 : i32, i32, i32, i32
  }
}

</mosaic_0001>

<bundles_post_ra>
// kernel: yolo_detector_forward.1
= control target key start
LH: loop header
LB: loop body
LE: loop exit
PB: predicated region body
PF: predicated region fallthrough
CT: control target
= control target key end

     0   :  { %s974_s21 = smov 0   ;;  %s976_s22 = smov 0   ;;  %s1113_s0 = inlined_call_operand.vmem [shape: bf16[2,2,8,306], index: 0, kind: input, shape index: {}]   ;;  %s1114_s1 = inlined_call_operand.vmem [shape: bf16[8,72], index: 1, kind: input, shape index: {}]   ;;  %s1115_s2 = inlined_call_operand.vmem [shape: f32[8,1], index: 2, kind: input, shape index: {}]   ;;  %s1116_s3 = inlined_call_operand.vmem [shape: f32[24,8], index: 3, kind: input, shape index: {}]   ;;  %s1117_s4 = inlined_call_operand.vmem [shape: f32[24,1], index: 4, kind: input, shape index: {}]   ;;  %s1118_s5 = inlined_call_operand.vmem [shape: f32[24,1], index: 5, kind: input, shape index: {}]   ;;  %s1119_s6 = inlined_call_operand.vmem [shape: f32[2,2,24,256], index: 6, kind: output, shape index: {}]  }
   0x1   :  { %s978_s23 = smov 0   ;;  %s980_s24 = smov 0  }
   0x2   :  { %s982_s25 = smov 0  }
   0x3 LB: > { %s25_s26 = sadd.s32 1, %s919_s23  ;;  %s28_s27 = sadd.s32 1, %s923_s24  ;;  %s927_s25 = sphi %s982_s25, %s16_s25   ;;  %s923_s24 = sphi %s980_s24, %s1123_s24   ;;  %s919_s23 = sphi %s978_s23, %s1122_s23   ;;  %s915_s22 = sphi %s976_s22, %s1121_s22   ;;  %s911_s21 = sphi %s974_s21, %s1120_s21  }
   0x4   : > { %p26_p0 = scmp.ge.s32.totalorder %s25_s26, 2  ;;  %p801_p1 = scmp.ge.s32.totalorder %s927_s25, 1 }
   0x5   : > { %p232_p2 = scmp.lt.s32.totalorder %s927_s25, 5 }
   0x6   : > { %s1125_s26 = smov (%p26_p0, %s25_s26), 0  ;;  %s1127_s27 = smov (!%p26_p0, %s28_s27), %s923_s24 }
   0x7   : > { %p233_p3 = pnand %p801_p1, %p232_p2  ;;  %p30_p4 = scmp.ge.s32.totalorder %s1127_s27, 2 }
   0x8   : > { %p270_p5 = scmp.lt.s32.totalorder (!%p233_p3), %s915_s22, 1  ;;  %p272_p6 = scmp.lt.s32.totalorder (!%p233_p3), %s911_s21, 1  ;;  %v935_v8 = vmov (!%p233_p3), 0   ;;  %v422_v10 = vld [vmem:[%s1115_s2] sm:$0xff] (!%p233_p3)  ;;  %v670_v11 = vld [vmem:[%s1118_s5 + $0x8] sm:$0xff] (!%p233_p3)  ;;  %v536_v12 = vld [vmem:[%s1117_s4 + $0x10] sm:$0xff] (!%p233_p3) }
   0x9   : > { %s1129_s27 = smov (%p30_p4, %s1127_s27), 0  ;;  %236 = sbr.rel (%p233_p3) target bundleno = 639 (0x27f), region = 44 }
   0xa   : > { %s929_s11 = smov (!%p233_p3), 126   ;;  %s930_s12 = smov (!%p233_p3), 127   ;;  %516 = vmatprep.mubr.bf16.mxu0 (!%p233_p3), %v935_v8  ;;  %875 = vset.pattern.permute.xlu0 (!%p233_p3), %v935_v8  ;;  %vm673_vm0 = vcmp.gt.f32.partialorder (!%p233_p3), %v670_v11, 0.5  ;;  %vm301_vm1 = vcmask (!%p233_p3), 1043456   ;;  %vm303_vm2 = vcmask (!%p233_p3), 1039360   ;;  %vm318_vm3 = vcmask (!%p233_p3), 1031168  }
   0xb   : > { %s931_s13 = smov (!%p233_p3), 110   ;;  %s932_s14 = smov (!%p233_p3), 109   ;;  %876 = vset.pattern.permute.xlu1 (!%p233_p3), %v935_v8  ;;  %v676_v13 = vsel (!%p233_p3), %vm673_vm0, 1, %v935_v8  ;;  %vm333_vm4 = vcmask (!%p233_p3), 900096   ;;  %vm348_vm5 = vcmask (!%p233_p3), 891904   ;;  %vm363_vm6 = vcmask (!%p233_p3), 883712  }
   0xc   : > { %s933_s15 = smov (!%p233_p3), 108   ;;  %s934_s16 = smov (!%p233_p3), 92   ;;  %vm378_vm7 = vcmask (!%p233_p3), 752640   ;;  %vm393_vm8 = vcmask (!%p233_p3), 744448   ;;  %vm408_vm9 = vcmask (!%p233_p3), 736256   ;;  %vm473_vm10 = vcmask (!%p233_p3), 588800  }
   0xd   : > { %s936_s17 = smov (!%p233_p3), 91   ;;  %s937_s18 = smov (!%p233_p3), 90   ;;  %v938_v11 = vmov (!%p233_p3), 0.0   ;;  %vm552_vm15 = vcmask (!%p233_p3), 64512  }
   0xe   : > { %626 = vmatprep.mubr.f32.mxu1 (!%p233_p3), %v938_v11 }
  0x10   : > { %s1131_s22 = smov (!%p270_p5, %s915_s22), 1  ;;  %s1133_s21 = smov (!%p272_p6, %s911_s21), 1 }
  0x11   : > { %s822_s28 = smul.u32 6, %s1131_s22 }
  0x12   : > { %s821_s29 = smul.u32 3, %s1133_s21 }
  0x13   : > { %s824_s8 = smul.u32 12, %s1131_s22 }
  0x14   : > { %s276_s30 = sadd.s32 %s822_s28, %s821_s29 }
  0x15   : > { %s802_s7 = sshll.u32 %s276_s30, 2 }
  0x16   : > { %s1013_s10 = scalar_lea.vmem %s1113_s0, %s802_s7  ;;  %s823_s7 = smul.u32 6, %s1133_s21 }
  0x17   : > { %v1016_v0 = vld [vmem:[%s1013_s10] sm:$0xff]  ;;  %v308_v1 = vld [vmem:[%s1013_s10 + $0x8] sm:$0xf] }
  0x18   : > { %311 = vrot.lane.b32.xlu1 %v1016_v0, %s929_s11  ;;  %295 = vrot.lane.b32.xlu0 %v1016_v0, %s930_s12  ;;  %v292_v2 = vld [vmem:[%s1013_s10 + $0x8] sm:$0xf]  ;;  %s285_s9 = sadd.s32 %s824_s8, %s823_s7 }
  0x19   : > { %v323_v3 = vld [vmem:[%s1013_s10 + $0x8] sm:$0xf] }
  0x1a   : > { %v338_v4 = vld [vmem:[%s1013_s10 + $0x8] sm:$0xf] }
  0x1b   : > { %v353_v5 = vld [vmem:[%s1013_s10 + $0x8] sm:$0xf] }
  0x1c   : > { %313 = vrot.lane.b32.xlu1 %v308_v1, %s929_s11  ;;  %297 = vrot.lane.b32.xlu0 %v292_v2, %s930_s12  ;;  %v368_v6 = vld [vmem:[%s1013_s10 + $0x8] sm:$0xf] }
  0x1d   : > { %v383_v7 = vld [vmem:[%s1013_s10 + $0x8] sm:$0xf] }
  0x1e   : > { %v398_v9 = vld [vmem:[%s1013_s10 + $0x8] sm:$0xf]  ;;  %s803_s10 = sshll.u32 %s285_s9, 3 }
  0x1f   : > { %s1090_s11 = scalar_lea.vmem %s1119_s6, %s803_s10 }
  0x20   : > { %328 = vrot.lane.b32.xlu1 %v323_v3, %s931_s13  ;;  %326 = vrot.lane.b32.xlu0 %v1016_v0, %s931_s13 }
  0x24   : > { %343 = vrot.lane.b32.xlu1 %v338_v4, %s932_s14  ;;  %341 = vrot.lane.b32.xlu0 %v1016_v0, %s932_s14 }
  0x28   : > { %358 = vrot.lane.b32.xlu1 %v353_v5, %s933_s15  ;;  %356 = vrot.lane.b32.xlu0 %v1016_v0, %s933_s15 }
  0x2c   : > { %373 = vrot.lane.b32.xlu1 %v368_v6, %s934_s16  ;;  %371 = vrot.lane.b32.xlu0 %v1016_v0, %s934_s16 }
  0x30   : > { %388 = vrot.lane.b32.xlu1 %v383_v7, %s936_s17  ;;  %386 = vrot.lane.b32.xlu0 %v1016_v0, %s936_s17 }
  0x34   : > { %403 = vrot.lane.b32.xlu1 %v398_v9, %s937_s18  ;;  %401 = vrot.lane.b32.xlu0 %v1016_v0, %s937_s18 }
  0x38   : > { %425 = vperm.xlu0 %875, %v422_v10   ;;  %v412_v10 = vld [vmem:[%s1114_s1] sm:$0xf] }
  0x3c   : > { %549 = vperm.xlu0 %875, %v536_v12   ;;  %v534_v12 = vld [vmem:[%s1117_s4] sm:$0xff] }
  0x3d   : > { %539 = vperm.xlu1 %876, %v534_v12  }
  0x40   : > { %682 = vperm.xlu0 %875, %v676_v13   ;;  %v669_v13 = vld [vmem:[%s1118_s5] sm:$0xff] }
  0x41   : > { %vm672_vm11 = vcmp.gt.f32.partialorder %v669_v13, 0.5 }
  0x8a   : > { %v312_v14 = vpop.permute.xlu1 %311  ;;  %v296_v15 = vpop.permute.xlu0 %295 }
  0x8b   : > { %v299_v18 = vrot.slane %v296_v15, 4  ;;  %v315_v21 = vrot.slane %v312_v14, 4 }
  0x8e   : > { %v314_v16 = vpop.permute.xlu1 %313  ;;  %v298_v17 = vpop.permute.xlu0 %297 }
  0x8f   : > { %v316_v19 = vrot.slane %v314_v16, 4  ;;  %v300_v20 = vrot.slane %v298_v17, 4  ;;  %v675_v16 = vsel %vm672_vm11, 1, %v935_v8 }
  0x91   : > { %v302_v22 = vsel %vm301_vm1, %v299_v18, %v300_v20  ;;  %v317_v23 = vsel %vm301_vm1, %v315_v21, %v316_v19 }
  0x92   : > { %v329_v24 = vpop.permute.xlu1 %328  ;;  %v327_v25 = vpop.permute.xlu0 %326  ;;  %v304_v26 = vsel %vm303_vm2, %v296_v15, %v302_v22  ;;  %v319_v32 = vsel %vm318_vm3, %v312_v14, %v317_v23  ;;  %v535_v14 = vld [vmem:[%s1117_s4 + $0x8] sm:$0xff]  ;;  %v671_v15 = vld [vmem:[%s1118_s5 + $0x10] sm:$0xff] }
  0x93   : > { %v331_v27 = vrot.slane %v329_v24, 4  ;;  %v330_v28 = vrot.slane %v327_v25, 4  ;;  %v805_v29 = vcombine.high %v1016_v0, %v304_v26  ;;  %v804_v30 = vcombine.low %v1016_v0, %v304_v26  ;;  %544 = vperm.xlu1 %876, %v535_v14  }
  0x94   : > { %vm674_vm12 = vcmp.gt.f32.partialorder %v671_v15, 0.5 }
  0x95   : > { %v332_v31 = vsel %vm301_vm1, %v330_v28, %v331_v27  ;;  %484 = vmatprep.subr.bf16.mxu0 %v805_v29  ;;  %v677_v17 = vsel %vm674_vm12, 1, %v935_v8  ;;  %v531_v28 = vld [vmem:[%s1116_s3] sm:$0xff]  ;;  %v532_v29 = vld [vmem:[%s1116_s3 + $0x8] sm:$0xff] }
  0x96   : > { %v334_v33 = vsel %vm333_vm4, %v327_v25, %v332_v31  ;;  %v344_v34 = vpop.permute.xlu1 %343  ;;  %v342_v35 = vpop.permute.xlu0 %341  ;;  %485 = vmatpush1.bf16.msra.mxu0 %v804_v30  ;;  %v533_v30 = vld [vmem:[%s1116_s3 + $0x10] sm:$0xff] }
  0x97   : > { %v806_v36 = vcombine.low %v319_v32, %v334_v33  ;;  %v807_v37 = vcombine.high %v319_v32, %v334_v33  ;;  %v346_v38 = vrot.slane %v344_v34, 4  ;;  %v345_v39 = vrot.slane %v342_v35, 4  ;;  %679 = vperm.xlu1 %876, %v675_v16  }
  0x99   : > { %486 = vmatprep.subr.bf16.mxu0 %v807_v37  ;;  %v347_v42 = vsel %vm301_vm1, %v345_v39, %v346_v38 }
  0x9a   : > { %v359_v40 = vpop.permute.xlu1 %358  ;;  %v357_v41 = vpop.permute.xlu0 %356  ;;  %487 = vmatpush1.bf16.msra.mxu0 %v806_v36  ;;  %v349_v46 = vsel %vm348_vm5, %v342_v35, %v347_v42 }
  0x9b   : > { %v361_v43 = vrot.slane %v359_v40, 4  ;;  %v360_v44 = vrot.slane %v357_v41, 4  ;;  %685 = vperm.xlu1 %876, %v677_v17  }
  0x9d   : > { %v362_v45 = vsel %vm301_vm1, %v360_v44, %v361_v43 }
  0x9e   : > { %v364_v47 = vsel %vm363_vm6, %v357_v41, %v362_v45  ;;  %v374_v48 = vpop.permute.xlu1 %373  ;;  %v372_v49 = vpop.permute.xlu0 %371 }
  0x9f   : > { %v808_v50 = vcombine.low %v349_v46, %v364_v47  ;;  %v809_v51 = vcombine.high %v349_v46, %v364_v47  ;;  %v376_v52 = vrot.slane %v374_v48, 4  ;;  %v375_v53 = vrot.slane %v372_v49, 4 }
  0xa1   : > { %488 = vmatprep.subr.bf16.mxu0 %v809_v51  ;;  %v377_v56 = vsel %vm301_vm1, %v375_v53, %v376_v52 }
  0xa2   : > { %v389_v54 = vpop.permute.xlu1 %388  ;;  %v387_v55 = vpop.permute.xlu0 %386  ;;  %489 = vmatpush1.bf16.msra.mxu0 %v808_v50  ;;  %v379_v60 = vsel %vm378_vm7, %v372_v49, %v377_v56 }
  0xa3   : > { %v391_v57 = vrot.slane %v389_v54, 4  ;;  %v390_v58 = vrot.slane %v387_v55, 4 }
  0xa5   : > { %v392_v59 = vsel %vm301_vm1, %v390_v58, %v391_v57 }
  0xa6   : > { %v394_v61 = vsel %vm393_vm8, %v387_v55, %v392_v59  ;;  %v404_v62 = vpop.permute.xlu1 %403  ;;  %v402_v63 = vpop.permute.xlu0 %401 }
  0xa7   : > { %v810_v0 = vcombine.low %v379_v60, %v394_v61  ;;  %v811_v1 = vcombine.high %v379_v60, %v394_v61  ;;  %v406_v2 = vrot.slane %v404_v62, 4  ;;  %v405_v3 = vrot.slane %v402_v63, 4 }
  0xa9   : > { %v407_v4 = vsel %vm301_vm1, %v405_v3, %v406_v2  ;;  %490 = vmatprep.subr.bf16.mxu0 %v811_v1 }
  0xaa   : > { %v409_v5 = vsel %vm408_vm9, %v402_v63, %v407_v4  ;;  %491 = vmatpush1.bf16.msra.mxu0 %v810_v0 }
  0xab   : > { %v812_v6 = vcombine.low %v409_v5, %v409_v5  ;;  %v813_v7 = vcombine.high %v409_v5, %v409_v5 }
  0xad   : > { %814 = vmatprep.subr.msk.bf16.mxu0 %vm301_vm1, %v813_v7  ;;  %v479_v9 = vsel %vm301_vm1, %v812_v6, 0 }
  0xae   : > { %493 = vmatpush1.bf16.msra.mxu0 %v479_v9 }
  0xb1   : > { %815 = vmatmul.mubr.msk.bf16.vlgmr.msra.gmra.mrb[0].mxu0 %vm473_vm10, %v412_v10 }
  0xb7   : > { %v426_v18 = vpop.permute.xlu0 %425 }
  0xbb   : > { %v550_v44 = vpop.permute.xlu0 %549 }
  0xbc   : > { %v540_v31 = vpop.permute.xlu1 %539 }
  0xbf   : > { %v683_v61 = vpop.permute.xlu0 %682 }
  0xc0   : > { %vm688_vm1 = vcmp.eq.s32.totalorder %v683_v61, 1 }
 0x112   : > { %v545_v37 = vpop.permute.xlu1 %544 }
 0x116   : > { %v680_v57 = vpop.permute.xlu1 %679 }
 0x117   : > { %vm687_vm0 = vcmp.eq.s32.totalorder %v680_v57, 1 }
 0x11a   : > { %v686_v7 = vpop.permute.xlu1 %685 }
 0x11b   : > { %vm689_vm2 = vcmp.eq.s32.totalorder %v686_v7, 1 }
 0x184   : > { %v518_v19 = vpop.f32.mrb[0].mxu0 }
 0x185   : > { %v519_v20 = vadd.f32 %v518_v19, %v426_v18  ;;  %v520_v21 = vpop.f32.mrb[1].mxu0 }
 0x186   : > { %v521_v22 = vadd.f32 %v520_v21, %v426_v18  ;;  %v522_v23 = vpop.f32.mrb[2].mxu0 }
 0x187   : > { %v523_v24 = vpop.f32.mrb[3].mxu0  ;;  %v527_v25 = vmul.f32 0.01, %v519_v20  ;;  %vm525_vm14 = vcmp.gt.f32.partialorder %v519_v20, 0.0 }
 0x188   : > { %vm526_vm13 = vcmp.gt.f32.partialorder %v521_v22, 0.0  ;;  %v528_v26 = vmul.f32 0.01, %v521_v22 }
 0x189   : > { %v529_v8 = vsel %vm525_vm14, %v519_v20, %v527_v25 }
 0x18a   : > { %v530_v27 = vsel %vm526_vm13, %v521_v22, %v528_v26 }
 0x18b   : > { %562 = vmatprep.subr.mxu1 %v530_v27 }
 0x18c   : > { %563 = vmatpush1.msra.mxu1 %v529_v8 }
 0x18d   : > { %816 = vmatmul.mubr.msk.f32.vlgmr.msra.gmra.mrb[0].mxu1 %vm552_vm15, %v531_v28 }
 0x18e   : > { %632 = vmatprep.mubr.f32.mxu1 %v938_v11 }
 0x191   : > { %817 = vmatmul.mubr.msk.f32.gmra.mrb[2].mxu1 %vm552_vm15, %v532_v29 }
 0x192   : > { %638 = vmatprep.mubr.f32.mxu1 %v938_v11 }
 0x195   : > { %818 = vmatmul.mubr.msk.f32.gmra.mrb[4].mxu1 %vm552_vm15, %v533_v30 }
 0x260   : > { %v628_v32 = vpop.f32.mrb[0].mxu1 }
 0x261   : > { %v629_v33 = vadd.f32 %v628_v32, %v540_v31  ;;  %v630_v34 = vpop.f32.mrb[1].mxu1 }
 0x262   : > { %v631_v35 = vadd.f32 %v630_v34, %v540_v31 }
 0x263   : > { %v645_v36 = vmul.f32 0.5, %v629_v33 }
 0x264   : > { %v646_v38 = vmul.f32 0.5, %v631_v35  ;;  %v634_v39 = vpop.f32.mrb[2].mxu1 }
 0x265   : > { %877 = vtanh.f32 %v645_v36  ;;  %v635_v40 = vadd.f32 %v634_v39, %v545_v37  ;;  %v636_v41 = vpop.f32.mrb[3].mxu1 }
 0x266   : > { %879 = vtanh.f32 %v646_v38  ;;  %v637_v42 = vadd.f32 %v636_v41, %v545_v37 }
 0x267   : > { %v647_v43 = vmul.f32 0.5, %v635_v40 }
 0x268   : > { %v648_v45 = vmul.f32 0.5, %v637_v42  ;;  %v640_v46 = vpop.f32.mrb[4].mxu1 }
 0x269   : > { %881 = vtanh.f32 %v647_v43  ;;  %v641_v47 = vadd.f32 %v640_v46, %v550_v44  ;;  %v642_v48 = vpop.f32.mrb[5].mxu1 }
 0x26a   : > { %883 = vtanh.f32 %v648_v45  ;;  %v643_v49 = vadd.f32 %v642_v48, %v550_v44 }
 0x26b   : > { %v649_v50 = vmul.f32 0.5, %v641_v47 }
 0x26c   : > { %v650_v51 = vmul.f32 0.5, %v643_v49 }
 0x26d   : > { %885 = vtanh.f32 %v649_v50 }
 0x26e   : > { %887 = vtanh.f32 %v650_v51 }
 0x26f   : > { %v878_v52 = vpop.eup %877 }
 0x270   : > { %v880_v53 = vpop.eup %879  ;;  %v657_v54 = vmul.f32 0.5, %v878_v52 }
 0x271   : > { %v658_v55 = vmul.f32 0.5, %v880_v53 }
 0x272   : > { %v663_v56 = vadd.f32 0.5, %v657_v54 }
 0x273   : > { %v882_v58 = vpop.eup %881  ;;  %v664_v59 = vadd.f32 0.5, %v658_v55 }
 0x274   : > { %v884_v60 = vpop.eup %883  ;;  %v690_v62 = vsel %vm687_vm0, %v629_v33, %v663_v56  ;;  %v659_v63 = vmul.f32 0.5, %v882_v58 }
 0x275   : > { %696 = vst [vmem:[%s1090_s11] sm:$0xff] %v690_v62  ;;  %v691_v0 = vsel %vm687_vm0, %v631_v35, %v664_v59  ;;  %v660_v1 = vmul.f32 0.5, %v884_v60 }
 0x276   : > { %697 = vst [vmem:[%s1090_s11 + $0x8] sm:$0xff] %v691_v0  ;;  %v665_v2 = vadd.f32 0.5, %v659_v63 }
 0x277   : > { %v886_v3 = vpop.eup %885  ;;  %v666_v4 = vadd.f32 0.5, %v660_v1 }
 0x278   : > { %v888_v5 = vpop.eup %887  ;;  %v692_v6 = vsel %vm688_vm1, %v635_v40, %v665_v2  ;;  %v661_v9 = vmul.f32 0.5, %v886_v3 }
 0x279   : > { %698 = vst [vmem:[%s1090_s11 + $0x10] sm:$0xff] %v692_v6  ;;  %v693_v10 = vsel %vm688_vm1, %v637_v42, %v666_v4  ;;  %v662_v11 = vmul.f32 0.5, %v888_v5 }
 0x27a   : > { %699 = vst [vmem:[%s1090_s11 + $0x18] sm:$0xff] %v693_v10  ;;  %v667_v12 = vadd.f32 0.5, %v661_v9 }
 0x27b   : > { %v668_v13 = vadd.f32 0.5, %v662_v11 }
 0x27c   : > { %v694_v14 = vsel %vm689_vm2, %v641_v47, %v667_v12 }
 0x27d   : > { %700 = vst [vmem:[%s1090_s11 + $0x20] sm:$0xff] %v694_v14  ;;  %v695_v15 = vsel %vm689_vm2, %v643_v49, %v668_v13 }
 0x27e   : > { %701 = vst [vmem:[%s1090_s11 + $0x28] sm:$0xff] %v695_v15 }
 0x27f PF: > { %s16_s25 = sadd.s32 1, %s927_s25   ;;  %s1120_s21 = smov %s919_s23 }
 0x280   : > { %p13_p7 = scmp.ge.s32.totalorder %s16_s25, 6   ;;  %s1121_s22 = smov %s923_s24 }
 0x281   : > { %s1122_s23 = smov %s1125_s26  ;;  %s1123_s24 = smov %s1129_s27 }
 0x282   :  { %15 = sbr.rel (!%p13_p7) target bundleno = 3 (0x3), region = 74 }

</bundles_post_ra>
